<compile_context>
chip_gen: v7x
topology: tpu7x:2x2x1
jax: 0.10.0
libtpu: 0.0.40
codegen_flags: <defaults>
</compile_context>

<pallas_src>
import functools

import jax
import jax.numpy as jnp
from jax.experimental import pallas as pl
from jax.experimental.pallas import tpu as pltpu

IGNORE_VALUE = 255           # module's ignore marker
SMOOTH_DEFAULT = 1e-8        # module default smooth=1e-08
LANE = 128
SUBLANE = 8
MAX_TILE_ROWS = 2048         # 2048*128 f32 = 1 MiB / input tile; x2 inputs x2 buffers = 4 MiB VMEM

_CORE_PARALLEL = getattr(pltpu, "CORE_PARALLEL", pltpu.PARALLEL)


def _cdiv(a, b):
    return -(-a // b)


def _tensorcores_per_chip():
    """2 on v7x (2 TensorCores/chip), 1 on v5e/v6e.  Best effort; defaults to 1."""
    try:
        kind = jax.devices()[0].device_kind.lower()
    except Exception:
        return 1
    return 2 if ("7x" in kind or "v7" in kind) else 1


def _row_alignment(*dtypes):
    """Sublane multiple so a (tile_rows, 128) block respects every input's native
    layout tiling: f32/i32 -> 8, bf16 -> 16, (u)int8 -> 32."""
    m = SUBLANE
    for dt in dtypes:
        m = max(m, SUBLANE * (4 // jnp.dtype(dt).itemsize))
    return m


def _pdice_kernel(pred_ref, tgt_ref, out_ref, pt_acc, p_acc, t_acc, *, rows_valid):
    """Grid = (chunk, row-tile).  chunk is CORE_PARALLEL on v7x, size 1 elsewhere.

    Per-(sublane, lane) partial sums are accumulated in VMEM scratch and written out
    once per chunk at the last step; the scalar dice is a tiny JAX epilogue."""
    c = pl.program_id(0)
    i = pl.program_id(1)

    @pl.when(i == 0)
    def _():
        pt_acc[...] = jnp.zeros_like(pt_acc)
        p_acc[...] = jnp.zeros_like(p_acc)
        t_acc[...] = jnp.zeros_like(t_acc)

    tile_rows = pred_ref.shape[0]
    x = pred_ref[...].astype(jnp.float32)            # (tile_rows, 128)
    t = tgt_ref[...].astype(jnp.float32)             # (tile_rows, 128)

    # In-kernel tail masking (replaces the old wrapper-side jnp.pad copy): any row at
    # or beyond `rows_valid` is out-of-bounds garbage from a partial edge block (or a
    # clamped fully-OOB block) and must contribute nothing.
    row0 = (c * pl.num_programs(1) + i) * tile_rows
    row_ids = row0 + jax.lax.broadcasted_iota(jnp.int32, x.shape, 0)
    valid = (row_ids < rows_valid) & (t != float(IGNORE_VALUE))

    p = jax.nn.sigmoid(x)                            # transcendental on the EUP slot
    pm = jnp.where(valid, p, 0.0)
    tm = jnp.where(valid, t, 0.0)

    # Reduce whole (8,128) vreg groups with plain VALU adds; no cross-sublane XLU work
    # and no masked partial stores inside the hot loop.
    g = tile_rows // SUBLANE
    pt_acc[...] += jnp.sum((pm * tm).reshape(g, SUBLANE, LANE), axis=0)
    p_acc[...] += jnp.sum(pm.reshape(g, SUBLANE, LANE), axis=0)
    t_acc[...] += jnp.sum(tm.reshape(g, SUBLANE, LANE), axis=0)

    @pl.when(i == pl.num_programs(1) - 1)
    def _():
        out_ref[0, 0, :, :] = pt_acc[...]
        out_ref[0, 1, :, :] = p_acc[...]
        out_ref[0, 2, :, :] = t_acc[...]


def p_dice_loss_pallas(prediction, target, smooth=SMOOTH_DEFAULT, *,
                       max_tile_rows=MAX_TILE_ROWS, num_chunks=None):
    """prediction: logits (any float dtype), target: labels (255 = ignore).

    Targets may stay narrow (uint8/int32/bf16/f32); they are cast to f32 only inside
    VMEM.  int8 / bool targets are rejected: 255 is not representable, so ignored and
    padded pixels would silently stop being masked."""
    assert prediction.shape == target.shape
    if target.dtype == jnp.int8 or target.dtype == jnp.bool_:
        raise ValueError("target dtype must represent 255 exactly (use uint8/int32/"
                         "float); int8/bool would break the ignore mask.")

    n = prediction.size
    pred_flat = prediction.reshape(-1)               # no transpose, no dtype upcast
    tgt_flat = target.reshape(-1)                    # keep native (possibly narrow) dtype

    row_align = _row_alignment(prediction.dtype, target.dtype)
    elem_align = row_align * LANE

    # Zero-copy in the common case (n a multiple of elem_align).  Only oddly sized
    # inputs take this small pad; padded targets are IGNORE_VALUE so they are masked.
    if n % elem_align != 0:
        pad = elem_align - n % elem_align
        pred_flat = jnp.pad(pred_flat, (0, pad))
        tgt_flat = jnp.pad(tgt_flat, (0, pad), constant_values=IGNORE_VALUE)

    rows = pred_flat.size // LANE                    # multiple of row_align
    pred2 = pred_flat.reshape(rows, LANE)            # lane-dense (rows, 128) view, no copy
    tgt2 = tgt_flat.reshape(rows, LANE)

    tile_rows = min(max(row_align, (max_tile_rows // row_align) * row_align), rows)
    steps_total = _cdiv(rows, tile_rows)

    cores = _tensorcores_per_chip()
    if num_chunks is None:
        num_chunks = cores if steps_total >= cores else 1
    num_chunks = max(1, min(num_chunks, steps_total))
    steps_per_chunk = _cdiv(steps_total, num_chunks)
    max_block = steps_total - 1                      # static: clamp any fully-OOB grid step

    if num_chunks > 1 and cores >= num_chunks:
        chunk_sem = _CORE_PARALLEL                   # real 2-TensorCore split on v7x
    elif num_chunks > 1:
        chunk_sem = pltpu.PARALLEL                   # harmless serial split elsewhere
    else:
        chunk_sem = pltpu.ARBITRARY

    def in_index(c, i):
        # Blocks beyond the last real block (odd steps_total split into 2 chunks) are
        # clamped here; the kernel's row mask zeroes their contribution.
        return (jnp.minimum(c * steps_per_chunk + i, max_block), 0)

    kernel = functools.partial(_pdice_kernel, rows_valid=rows)

    out_bytes = num_chunks * 3 * SUBLANE * LANE * 4
    cost = pl.CostEstimate(
        flops=8 * rows * LANE,
        transcendentals=rows * LANE,
        bytes_accessed=rows * LANE * (pred2.dtype.itemsize + tgt2.dtype.itemsize) + out_bytes,
    )

    partials = pl.pallas_call(
        kernel,
        out_shape=jax.ShapeDtypeStruct((num_chunks, 3, SUBLANE, LANE), jnp.float32),
        grid_spec=pltpu.PrefetchScalarGridSpec(
            num_scalar_prefetch=0,
            grid=(num_chunks, steps_per_chunk),
            in_specs=[
                pl.BlockSpec((tile_rows, LANE), in_index),
                pl.BlockSpec((tile_rows, LANE), in_index),
            ],
            out_specs=pl.BlockSpec((1, 3, SUBLANE, LANE), lambda c, i: (c, 0, 0, 0)),
            scratch_shapes=[
                pltpu.VMEM((SUBLANE, LANE), jnp.float32),   # sum(p * t) partials
                pltpu.VMEM((SUBLANE, LANE), jnp.float32),   # sum(p)     partials
                pltpu.VMEM((SUBLANE, LANE), jnp.float32),   # sum(t)     partials
            ],
        ),
        compiler_params=pltpu.CompilerParams(
            dimension_semantics=(chunk_sem, pltpu.ARBITRARY)),
        cost_estimate=cost,
    )(pred2, tgt2)

    # Tiny epilogue: reduce (num_chunks, 3, 8, 128) partials to the scalar dice loss.
    sums = jnp.sum(partials, axis=(0, 2, 3))         # [sum(p*t), sum(p), sum(t)]
    intersection = 2.0 * sums[0] + smooth
    union = sums[1] + sums[2] + smooth
    return 1.0 - intersection / union


def p_dice_loss_ref(prediction, target, smooth=SMOOTH_DEFAULT):
    """Pure-JAX reference mirroring the PyTorch module exactly."""
    p = jax.nn.sigmoid(prediction.astype(jnp.float32))
    t = target.astype(jnp.float32)
    valid = (t != float(IGNORE_VALUE)).astype(jnp.float32)
    p = p * valid
    t = t * valid
    intersection = 2.0 * jnp.sum(p * t) + smooth
    union = jnp.sum(p) + jnp.sum(t) + smooth
    return 1.0 - intersection / union


if __name__ == "__main__":
    key = jax.random.PRNGKey(0)

    def make_case(k, shape, pred_dtype, tgt_dtype):
        k1, k2 = jax.random.split(k)
        pred = jax.random.normal(k1, shape, dtype=jnp.float32).astype(pred_dtype)
        raw = jax.random.randint(k2, shape, 0, 3)             # {0,1,2}; 2 -> ignore
        tgt = jnp.where(raw == 2, IGNORE_VALUE, raw).astype(tgt_dtype)
        return pred, tgt

    cases = [
        # (shape, pred dtype, target dtype, wrapper kwargs)
        ((2, 1, 16, 16), jnp.float32, jnp.float32, {}),                 # tiny, pad-fallback path
        ((2, 1, 96, 64), jnp.float32, jnp.int32,                        # multi-step per chunk,
         dict(max_tile_rows=32, num_chunks=2)),                         # 2-chunk split + OOB-block clamp
        ((2, 1, 96, 64), jnp.bfloat16, jnp.bfloat16,                    # ragged tail block (row mask),
         dict(max_tile_rows=64)),                                       # narrow bf16 streams, zero-copy
    ]

    keys = jax.random.split(key, len(cases))
    for k, (shape, pdt, tdt, kw) in zip(keys, cases):
        pred, tgt = make_case(k, shape, pdt, tdt)
        loss = jax.block_until_ready(p_dice_loss_pallas(pred, tgt, **kw))
        ref = jax.block_until_ready(p_dice_loss_ref(pred, tgt))
        assert jnp.allclose(loss, ref, atol=5e-5, rtol=5e-5), (shape, loss, ref)

    print("KERNEL_OK")
</pallas_src>

<mosaic_0001>
module attributes {stable_mosaic.version = 11 : i64} {
  func.func @_pdice_kernel(%arg0: i32, %arg1: i32, %arg2: memref<8x128xf32, #tpu.memory_space<vmem>>, %arg3: memref<8x128xf32, #tpu.memory_space<vmem>>, %arg4: memref<1x3x8x128xf32, #tpu.memory_space<vmem>>, %arg5: memref<8x128xf32, #tpu.memory_space<vmem>>, %arg6: memref<8x128xf32, #tpu.memory_space<vmem>>, %arg7: memref<8x128xf32, #tpu.memory_space<vmem>>) attributes {dimension_semantics = [#tpu.dimension_semantics<arbitrary>, #tpu.dimension_semantics<arbitrary>], iteration_bounds = array<i64: 1, 1>, scalar_prefetch = 0 : i64, scratch_operands = 3 : i64, tpu.core_type = #tpu.core_type<tc>, window_params = [{transform_indices = @transform_0, window_bounds = array<i64: 8, 128>}, {transform_indices = @transform_1, window_bounds = array<i64: 8, 128>}, {transform_indices = @transform_2, window_bounds = array<i64: 1, 3, 8, 128>}]} {
    %c0_i32 = arith.constant 0 : i32
    %0 = arith.cmpi eq, %arg1, %c0_i32 : i32
    %1 = arith.extui %0 : i1 to i32
    %c0_i32_0 = arith.constant 0 : i32
    %2 = arith.cmpi ne, %1, %c0_i32_0 : i32
    scf.if %2 {
      %cst_25 = arith.constant 0.000000e+00 : f32
      %44 = vector.broadcast %cst_25 : f32 to vector<8x128xf32>
      %c0_26 = arith.constant 0 : index
      %c0_27 = arith.constant 0 : index
      %45 = vector.load %arg5[%c0_26, %c0_27] : memref<8x128xf32, #tpu.memory_space<vmem>>, vector<8x128xf32>
      tpu.vector_store %arg5[%c0_26, %c0_27], %44 {strides = array<i32>} : memref<8x128xf32, #tpu.memory_space<vmem>>, vector<8x128xf32>,
      %cst_28 = arith.constant 0.000000e+00 : f32
      %46 = vector.broadcast %cst_28 : f32 to vector<8x128xf32>
      %c0_29 = arith.constant 0 : index
      %c0_30 = arith.constant 0 : index
      %47 = vector.load %arg6[%c0_29, %c0_30] : memref<8x128xf32, #tpu.memory_space<vmem>>, vector<8x128xf32>
      tpu.vector_store %arg6[%c0_29, %c0_30], %46 {strides = array<i32>} : memref<8x128xf32, #tpu.memory_space<vmem>>, vector<8x128xf32>,
      %cst_31 = arith.constant 0.000000e+00 : f32
      %48 = vector.broadcast %cst_31 : f32 to vector<8x128xf32>
      %c0_32 = arith.constant 0 : index
      %c0_33 = arith.constant 0 : index
      %49 = vector.load %arg7[%c0_32, %c0_33] : memref<8x128xf32, #tpu.memory_space<vmem>>, vector<8x128xf32>
      tpu.vector_store %arg7[%c0_32, %c0_33], %48 {strides = array<i32>} : memref<8x128xf32, #tpu.memory_space<vmem>>, vector<8x128xf32>,
    } else {
    }
    %c0 = arith.constant 0 : index
    %c0_1 = arith.constant 0 : index
    %3 = vector.load %arg2[%c0, %c0_1] : memref<8x128xf32, #tpu.memory_space<vmem>>, vector<8x128xf32>
    %c0_2 = arith.constant 0 : index
    %c0_3 = arith.constant 0 : index
    %4 = vector.load %arg3[%c0_2, %c0_3] : memref<8x128xf32, #tpu.memory_space<vmem>>, vector<8x128xf32>
    %c1_i32 = arith.constant 1 : i32
    %5 = arith.muli %arg0, %c1_i32 : i32
    %6 = arith.addi %5, %arg1 : i32
    %c8_i32 = arith.constant 8 : i32
    %7 = arith.muli %6, %c8_i32 : i32
    %8 = tpu.iota {dimensions = array<i32: 0>} : vector<8x128xi32>
    %9 = vector.broadcast %7 : i32 to vector<8x128xi32>
    %10 = arith.addi %9, %8 : vector<8x128xi32>
    %c8_i32_4 = arith.constant 8 : i32
    %11 = vector.broadcast %c8_i32_4 : i32 to vector<8x128xi32>
    %12 = arith.cmpi slt, %10, %11 : vector<8x128xi32>
    %cst = arith.constant 2.550000e+02 : f32
    %13 = vector.broadcast %cst : f32 to vector<8x128xf32>
    %14 = arith.cmpf one, %4, %13 : vector<8x128xf32>
    %15 = arith.andi %12, %14 : vector<8x128xi1>
    %16 = arith.negf %3 : vector<8x128xf32>
    %17 = math.exp %16 : vector<8x128xf32>
    %cst_5 = arith.constant 1.000000e+00 : f32
    %18 = vector.broadcast %cst_5 : f32 to vector<8x128xf32>
    %19 = arith.addf %18, %17 : vector<8x128xf32>
    %20 = arith.divf %18, %19 : vector<8x128xf32>
    %cst_6 = arith.constant 0.000000e+00 : f32
    %21 = vector.broadcast %cst_6 : f32 to vector<8x128xf32>
    %22 = arith.select %15, %20, %21 : vector<8x128xi1>, vector<8x128xf32>
    %cst_7 = arith.constant 0.000000e+00 : f32
    %23 = vector.broadcast %cst_7 : f32 to vector<8x128xf32>
    %24 = arith.select %15, %4, %23 : vector<8x128xi1>, vector<8x128xf32>
    %c0_8 = arith.constant 0 : index
    %c0_9 = arith.constant 0 : index
    %25 = vector.load %arg5[%c0_8, %c0_9] : memref<8x128xf32, #tpu.memory_space<vmem>>, vector<8x128xf32>
    %26 = arith.mulf %22, %24 : vector<8x128xf32>
    %27 = vector.shape_cast %26 : vector<8x128xf32> to vector<1x8x128xf32>
    %cst_10 = arith.constant dense<0.000000e+00> : vector<8x128xf32>
    %28 = vector.multi_reduction <add>, %27, %cst_10 [0] : vector<1x8x128xf32> to vector<8x128xf32>
    %29 = arith.addf %25, %28 : vector<8x128xf32>
    %c0_11 = arith.constant 0 : index
    %c0_12 = arith.constant 0 : index
    %30 = vector.load %arg5[%c0_11, %c0_12] : memref<8x128xf32, #tpu.memory_space<vmem>>, vector<8x128xf32>
    tpu.vector_store %arg5[%c0_11, %c0_12], %29 {strides = array<i32>} : memref<8x128xf32, #tpu.memory_space<vmem>>, vector<8x128xf32>,
    %c0_13 = arith.constant 0 : index
    %c0_14 = arith.constant 0 : index
    %31 = vector.load %arg6[%c0_13, %c0_14] : memref<8x128xf32, #tpu.memory_space<vmem>>, vector<8x128xf32>
    %32 = vector.shape_cast %22 : vector<8x128xf32> to vector<1x8x128xf32>
    %cst_15 = arith.constant dense<0.000000e+00> : vector<8x128xf32>
    %33 = vector.multi_reduction <add>, %32, %cst_15 [0] : vector<1x8x128xf32> to vector<8x128xf32>
    %34 = arith.addf %31, %33 : vector<8x128xf32>
    %c0_16 = arith.constant 0 : index
    %c0_17 = arith.constant 0 : index
    %35 = vector.load %arg6[%c0_16, %c0_17] : memref<8x128xf32, #tpu.memory_space<vmem>>, vector<8x128xf32>
    tpu.vector_store %arg6[%c0_16, %c0_17], %34 {strides = array<i32>} : memref<8x128xf32, #tpu.memory_space<vmem>>, vector<8x128xf32>,
    %c0_18 = arith.constant 0 : index
    %c0_19 = arith.constant 0 : index
    %36 = vector.load %arg7[%c0_18, %c0_19] : memref<8x128xf32, #tpu.memory_space<vmem>>, vector<8x128xf32>
    %37 = vector.shape_cast %24 : vector<8x128xf32> to vector<1x8x128xf32>
    %cst_20 = arith.constant dense<0.000000e+00> : vector<8x128xf32>
    %38 = vector.multi_reduction <add>, %37, %cst_20 [0] : vector<1x8x128xf32> to vector<8x128xf32>
    %39 = arith.addf %36, %38 : vector<8x128xf32>
    %c0_21 = arith.constant 0 : index
    %c0_22 = arith.constant 0 : index
    %40 = vector.load %arg7[%c0_21, %c0_22] : memref<8x128xf32, #tpu.memory_space<vmem>>, vector<8x128xf32>
    tpu.vector_store %arg7[%c0_21, %c0_22], %39 {strides = array<i32>} : memref<8x128xf32, #tpu.memory_space<vmem>>, vector<8x128xf32>,
    %c0_i32_23 = arith.constant 0 : i32
    %41 = arith.cmpi eq, %arg1, %c0_i32_23 : i32
    %42 = arith.extui %41 : i1 to i32
    %c0_i32_24 = arith.constant 0 : i32
    %43 = arith.cmpi ne, %42, %c0_i32_24 : i32
    scf.if %43 {
      %c0_25 = arith.constant 0 : index
      %c0_26 = arith.constant 0 : index
      %44 = vector.load %arg5[%c0_25, %c0_26] : memref<8x128xf32, #tpu.memory_space<vmem>>, vector<8x128xf32>
      %c0_27 = arith.constant 0 : index
      %c0_28 = arith.constant 0 : index
      %c0_29 = arith.constant 0 : index
      %c0_30 = arith.constant 0 : index
      %45 = vector.load %arg4[%c0_27, %c0_28, %c0_29, %c0_30] : memref<1x3x8x128xf32, #tpu.memory_space<vmem>>, vector<1x1x8x128xf32>
      %46 = vector.shape_cast %45 : vector<1x1x8x128xf32> to vector<8x128xf32>
      %47 = vector.shape_cast %44 : vector<8x128xf32> to vector<1x1x8x128xf32>
      tpu.vector_store %arg4[%c0_27, %c0_28, %c0_29, %c0_30], %47 {strides = array<i32>} : memref<1x3x8x128xf32, #tpu.memory_space<vmem>>, vector<1x1x8x128xf32>,
      %c0_31 = arith.constant 0 : index
      %c0_32 = arith.constant 0 : index
      %48 = vector.load %arg6[%c0_31, %c0_32] : memref<8x128xf32, #tpu.memory_space<vmem>>, vector<8x128xf32>
      %c0_33 = arith.constant 0 : index
      %c1 = arith.constant 1 : index
      %c0_34 = arith.constant 0 : index
      %c0_35 = arith.constant 0 : index
      %49 = vector.load %arg4[%c0_33, %c1, %c0_34, %c0_35] : memref<1x3x8x128xf32, #tpu.memory_space<vmem>>, vector<1x1x8x128xf32>
      %50 = vector.shape_cast %49 : vector<1x1x8x128xf32> to vector<8x128xf32>
      %51 = vector.shape_cast %48 : vector<8x128xf32> to vector<1x1x8x128xf32>
      tpu.vector_store %arg4[%c0_33, %c1, %c0_34, %c0_35], %51 {strides = array<i32>} : memref<1x3x8x128xf32, #tpu.memory_space<vmem>>, vector<1x1x8x128xf32>,
      %c0_36 = arith.constant 0 : index
      %c0_37 = arith.constant 0 : index
      %52 = vector.load %arg7[%c0_36, %c0_37] : memref<8x128xf32, #tpu.memory_space<vmem>>, vector<8x128xf32>
      %c0_38 = arith.constant 0 : index
      %c2 = arith.constant 2 : index
      %c0_39 = arith.constant 0 : index
      %c0_40 = arith.constant 0 : index
      %53 = vector.load %arg4[%c0_38, %c2, %c0_39, %c0_40] : memref<1x3x8x128xf32, #tpu.memory_space<vmem>>, vector<1x1x8x128xf32>
      %54 = vector.shape_cast %53 : vector<1x1x8x128xf32> to vector<8x128xf32>
      %55 = vector.shape_cast %52 : vector<8x128xf32> to vector<1x1x8x128xf32>
      tpu.vector_store %arg4[%c0_38, %c2, %c0_39, %c0_40], %55 {strides = array<i32>} : memref<1x3x8x128xf32, #tpu.memory_space<vmem>>, vector<1x1x8x128xf32>,
    } else {
    }
    return
  }
  func.func @transform_0(%arg0: i32, %arg1: i32) -> (i32, i32) {
    %c1_i32 = arith.constant 1 : i32
    %0 = arith.muli %arg0, %c1_i32 : i32
    %1 = arith.addi %0, %arg1 : i32
    %c0_i32 = arith.constant 0 : i32
    %2 = arith.minsi %1, %c0_i32 : i32
    %c0_i32_0 = arith.constant 0 : i32
    %c0_i32_1 = arith.constant 0 : i32
    return %2, %c0_i32_0 : i32, i32
  }
  func.func @transform_1(%arg0: i32, %arg1: i32) -> (i32, i32) {
    %c1_i32 = arith.constant 1 : i32
    %0 = arith.muli %arg0, %c1_i32 : i32
    %1 = arith.addi %0, %arg1 : i32
    %c0_i32 = arith.constant 0 : i32
    %2 = arith.minsi %1, %c0_i32 : i32
    %c0_i32_0 = arith.constant 0 : i32
    %c0_i32_1 = arith.constant 0 : i32
    return %2, %c0_i32_0 : i32, i32
  }
  func.func @transform_2(%arg0: i32, %arg1: i32) -> (i32, i32, i32, i32) {
    %c0_i32 = arith.constant 0 : i32
    %c0_i32_0 = arith.constant 0 : i32
    %c0_i32_1 = arith.constant 0 : i32
    %c0_i32_2 = arith.constant 0 : i32
    return %arg0, %c0_i32, %c0_i32_0, %c0_i32_1 : i32, i32, i32, i32
  }
}

</mosaic_0001>

<bundles_post_ra>
// kernel: tpu_custom_call.1
= control target key start
LH: loop header
LB: loop body
LE: loop exit
PB: predicated region body
PF: predicated region fallthrough
CT: control target
= control target key end

     0   :  { %7 = vsyncpa [#allocation6], 0  ;;  %s262_s0 = inlined_call_operand.hbm [shape: f32[8,128], index: 0, kind: input, shape index: {}]   ;;  %s263_s1 = inlined_call_operand.hbm [shape: f32[8,128], index: 1, kind: input, shape index: {}]   ;;  %s264_s2 = inlined_call_operand.hbm [shape: f32[1,3,8,128], index: 2, kind: output, shape index: {}]  }
   0x1   :  { %8 = vsyncpa [#allocation9], 0 }
   0x2   :  { %9 = vsyncpa [#allocation7], 0  ;;  %s206_s9 = smov [#allocation5]   ;;  %s207_s11 = smov [#allocation8]  }
   0x3   :  { %s21_s10 = sshll.u32 %s206_s9, 4  ;;  %s36_s12 = sshll.u32 %s207_s11, 4  ;;  %s22_s10 = int_to_ptr.vmem [resolvable:$true] %s21_s10  ;;  %s37_s12 = int_to_ptr.vmem [resolvable:$true] %s36_s12 }
   0x4   :  { %s134_s15 = scalar_lea.hbm %s262_s0, 128 }
   0x5   :  { %p135_p0 = scmp.ne.s32.totalorder %s262_s0, %s134_s15  ;;  %p138_p1 = scmp.lt.u32.totalorder %s134_s15, %s262_s0 }
   0x7   :  { %p140_p2 = pnand %p138_p1, %p135_p0 }
   0x9   :  { %143 = shalt.err (!%p140_p2)
}
   0xa   :  { %s144_s20 = scalar_lea.vmem %s22_s10, 128  ;;  %p149_p4 = scmp.lt.s32.totalorder %s22_s10, %s22_s10 }
   0xb   :  { %p145_p3 = scmp.ne.s32.totalorder %s22_s10, %s144_s20  ;;  %p150_p5 = scmp.lt.s32.totalorder %s144_s20, %s144_s20 }
   0xd   :  { %p151_p6 = por %p150_p5, %p149_p4 }
   0xf   :  { %p152_p7 = pnand %p151_p6, %p145_p3 }
  0x11   :  { %155 = shalt.err (!%p152_p7)
}
  0x12   :  { %24 = dma.hbm_to_vmem [thread:$0]  %s262_s0, 128, %s22_s10, [#allocation6]  }
  0x13   :  { %s156_s25 = scalar_lea.hbm %s263_s1, 128 }
  0x14   :  { %p157_p8 = scmp.ne.s32.totalorder %s263_s1, %s156_s25  ;;  %p160_p9 = scmp.lt.u32.totalorder %s156_s25, %s263_s1 }
  0x16   :  { %p162_p10 = pnand %p160_p9, %p157_p8 }
  0x18   :  { %165 = shalt.err (!%p162_p10)
}
  0x19   :  { %s166_s30 = scalar_lea.vmem %s37_s12, 128  ;;  %p171_p12 = scmp.lt.s32.totalorder %s37_s12, %s37_s12 }
  0x1a   :  { %p167_p11 = scmp.ne.s32.totalorder %s37_s12, %s166_s30  ;;  %p172_p13 = scmp.lt.s32.totalorder %s166_s30, %s166_s30 }
  0x1c   :  { %p173_p0 = por %p172_p13, %p171_p12 }
  0x1e   :  { %p174_p1 = pnand %p173_p0, %p167_p11 }
  0x20   :  { %177 = shalt.err (!%p174_p1)
}
  0x21   :  { %39 = dma.hbm_to_vmem [thread:$0]  %s263_s1, 128, %s37_s12, [#allocation9]  }
  0x22   :  { %200 = dma.done.wait [#allocation6], 128  }
  0x23   :  { %201 = vsyncadd [#allocation6], 4294967168 }
  0x24   :  { %202 = dma.done.wait [#allocation9], 128  }
  0x25   :  { %203 = vsyncadd [#allocation9], 4294967168  ;;  %v59_v0 = vld [vmem:[#allocation5] sm:$0xff]  ;;  %v60_v1 = vld [vmem:[#allocation8] sm:$0xff]  ;;  %s208_s4 = smov [#allocation10]  }
  0x26   :  { %vm68_vm0 = vcmp.ne.f32.partialorder %v60_v1, 255.0  ;;  %v124_v2 = vmul.f32 -1.442695, %v59_v0  ;;  %s107_s5 = sshll.u32 %s208_s4, 4  ;;  %s108_s5 = int_to_ptr.vmem [resolvable:$true] %s107_s5 }
  0x27   :  { %v77_v3 = vsel %vm68_vm0, %v60_v1, 0.0  ;;  %s178_s1 = scalar_lea.vmem %s108_s5, 384  ;;  %p183_p3 = scmp.lt.s32.totalorder %s108_s5, %s108_s5 }
  0x28   :  { %130 = vpow2.f32 %v124_v2  ;;  %101 = vst [vmem:[#allocation10 + $0x10] sm:$0xff] %v77_v3  ;;  %p179_p2 = scmp.ne.s32.totalorder %s108_s5, %s178_s1  ;;  %p184_p4 = scmp.lt.s32.totalorder %s178_s1, %s178_s1 }
  0x2a   :  { %p185_p5 = por %p184_p4, %p183_p3 }
  0x2c   :  { %p186_p6 = pnand %p185_p5, %p179_p2 }
  0x32   :  { %v131_v4 = vpop.eup %130 }
  0x33   :  { %v73_v5 = vadd.f32 1.0, %v131_v4 }
  0x35   :  { %132 = vrcp.f32 %v73_v5 }
  0x3f   :  { %v133_v6 = vpop.eup %132 }
  0x40   :  { %v76_v7 = vsel %vm68_vm0, %v133_v6, 0.0 }
  0x41   :  { %v79_v8 = vmul.f32 %v77_v3, %v76_v7  ;;  %98 = vst [vmem:[#allocation10 + $0x8] sm:$0xff] %v76_v7 }
  0x43   :  { %95 = vst [vmem:[#allocation10] sm:$0xff] %v79_v8 }
  0x44   :  { %189 = shalt.err (!%p186_p6)
}
  0x45   :  { %s190_s8 = scalar_lea.hbm %s264_s2, 384 }
  0x46   :  { %p191_p7 = scmp.ne.s32.totalorder %s264_s2, %s190_s8  ;;  %p194_p8 = scmp.lt.u32.totalorder %s190_s8, %s264_s2 }
  0x48   :  { %p196_p9 = pnand %p194_p8, %p191_p7 }
  0x4a   :  { %199 = shalt.err (!%p196_p9)
}
  0x4b   :  { %s209_s13 = smov 128   ;;  %s210_s14 = smov 8  }
  0x4c   :  { %113 = dma.vmem_to_hbm [thread:$0]  %s108_s5, 384, %s264_s2, [#allocation7], %s209_s13, %s209_s13, %s210_s14  }
  0x4d   :  { %204 = dma.done.wait [#allocation7], 384  }
  0x4e   :  { %205 = vsyncadd [#allocation7], 4294966912 }
  0x4f   :  { %117 = vsyncpa [#allocation6], 1 }
  0x50   :  { %118 = vsyncpa [#allocation9], 1 }
  0x51   :  { %119 = vsyncpa [#allocation7], 1 }

</bundles_post_ra>
